<compile_context>
chip_gen: v5e
topology: v5e:2x2
jax: 0.10.0
libtpu: 0.0.40
codegen_flags: <defaults>
</compile_context>

<pallas_src>
import jax
import jax.numpy as jnp
from jax.experimental import pallas as pl
from jax.experimental.pallas import tpu as pltpu


# ----------------------------------------------------------------------------
# Kernel bodies
# ----------------------------------------------------------------------------

def _routing_tile(x, old, w_x, w1, b1, w2, b2, out_ref):
    """Per-(batch, seq-tile) math. x/old: [TS, D]; w_x: [D, 2D]; w1: [D, D];
    b1/w2: [1, D]; b2: scalar; writes out_ref[0] ([TS, D])."""
    D = x.shape[-1]
    wdt = w_x.dtype  # bf16

    # Fused projection: one [TS, D] @ [D, 2D] MXU matmul, f32 accumulation.
    # Lanes [0:D) = shared projection, lanes [D:2D) = per-language projection
    # (D is 128-aligned, so the split is relayout-free).
    h = jnp.dot(x.astype(wdt), w_x, preferred_element_type=jnp.float32)
    share_h = h[:, :D]
    lang_h = h[:, D:]

    # GateLayer: relu(old @ W1 + b1) + old, then Linear(D -> 1), then sigmoid.
    g = jnp.dot(old.astype(wdt), w1, preferred_element_type=jnp.float32) + b1
    g = jnp.maximum(g, 0.0) + old
    # D -> 1 projection as a VPU mul + lane reduce (free next to the MXU).
    g2 = jnp.sum(g * w2, axis=-1, keepdims=True) + b2          # [TS, 1]
    gate = jax.nn.sigmoid(g2)

    out_ref[0] = (share_h + gate * (lang_h - share_h)).astype(out_ref.dtype)


def _resident_kernel(lang_ref,       # SMEM [B] int32 (scalar prefetch)
                     old_x_ref,      # VMEM [1, TS, D]
                     x_ref,          # VMEM [1, TS, D]
                     w_x_ref,        # VMEM [L, D, 2D] bf16 (ALL langs resident)
                     w1_ref,         # VMEM [L, D, D]  bf16
                     b1_ref,         # VMEM [L, 1, D]  f32
                     w2_ref,         # VMEM [L, 1, D]  f32
                     b2_ref,         # SMEM [L]        f32
                     out_ref):       # VMEM [1, TS, D]
    li = lang_ref[pl.program_id(0)]
    _routing_tile(x_ref[0], old_x_ref[0],
                  w_x_ref[li], w1_ref[li], b1_ref[li], w2_ref[li],
                  b2_ref[li], out_ref)


def _streamed_kernel(order_ref,      # SMEM [B] int32 (scalar prefetch, used in index_maps only)
                     lang_ref,       # SMEM [B] int32 (sorted langs, scalar prefetch)
                     old_x_ref,      # VMEM [1, TS, D]
                     x_ref,          # VMEM [1, TS, D]
                     w_x_ref,        # VMEM [1, D, 2D] bf16 (lang-selected)
                     w1_ref,         # VMEM [1, D, D]  bf16
                     b1_ref,         # VMEM [1, 1, D]  f32
                     w2_ref,         # VMEM [1, 1, D]  f32
                     b2_ref,         # SMEM [L]        f32
                     out_ref):       # VMEM [1, TS, D]
    del order_ref  # only consumed by the BlockSpec index_maps
    li = lang_ref[pl.program_id(0)]
    _routing_tile(x_ref[0], old_x_ref[0],
                  w_x_ref[0], w1_ref[0], b1_ref[0], w2_ref[0],
                  b2_ref[li], out_ref)


# ----------------------------------------------------------------------------
# Sizing helpers
# ----------------------------------------------------------------------------

def _vmem_capacity_bytes() -> int:
    try:
        info = pltpu.get_tpu_info()
        cap = getattr(info, "vmem_capacity_bytes", None)
        if cap:
            return int(cap)
    except Exception:
        pass
    return 64 << 20  # conservative fallback (v7x per-core VMEM)


def _pick_seq_tile(S: int) -> int:
    # Fixed large tile for MXU / DMA efficiency; the cdiv grid pads the tail.
    # (On v5e a 256 tile may be marginally better; 512 is safe everywhere.)
    return S if S <= 512 else 512


def _vmem_estimate(ts, D, L, wbytes, abytes, obytes, resident) -> int:
    weight_set = 3 * D * D * wbytes + 2 * D * 4           # w_x + w1 (bf16), b1 + w2 (f32)
    wtotal = 2 * (L if resident else 1) * weight_set       # Pallas double-buffers inputs
    act = 2 * 2 * ts * D * abytes                           # old_x + x, double-buffered
    out = 2 * ts * D * obytes                                # out, double-buffered
    inter = ts * (2 * D + 2 * D) * 4                         # h [ts,2D] + g [ts,D] + slack (f32)
    return wtotal + act + out + inter + (2 << 20)


# ----------------------------------------------------------------------------
# Wrapper
# ----------------------------------------------------------------------------

def routing_layer(old_x, x, lang, prep, *, force_streamed=False):
    B, S, D = x.shape
    L = prep["w_x"].shape[0]
    if D % 128 != 0:
        # TODO(synk): pad D up to a multiple of 128 instead of rejecting it.
        raise ValueError(f"feature size D={D} must be a multiple of 128 (lane width)")
    lang = lang.astype(jnp.int32)

    abytes = jnp.dtype(x.dtype).itemsize
    obytes = abytes
    wbytes = jnp.dtype(prep["w_x"].dtype).itemsize

    ts = _pick_seq_tile(S)
    n_s = pl.cdiv(S, ts)

    cap = _vmem_capacity_bytes()
    usable = (cap * 7) // 8                       # ~112 MiB on v5e/v6e, ~56 MiB on v7x

    res_est = _vmem_estimate(ts, D, L, wbytes, abytes, obytes, resident=True)
    str_est = _vmem_estimate(ts, D, L, wbytes, abytes, obytes, resident=False)
    use_resident = (not force_streamed) and (res_est <= usable)

    cost = pl.CostEstimate(
        flops=6 * B * S * D * D,                  # [S,D]@[D,2D] + [S,D]@[D,D] per batch elt
        transcendentals=B * S,                    # sigmoid
        bytes_accessed=(2 * B * S * D * abytes + B * S * D * obytes
                        + min(B, L) * 3 * D * D * wbytes),
    )

    if use_resident:
        # --- RESIDENT path: all languages' weights live in VMEM; no sorting. ---
        vmem_bytes = int(min(max(res_est, 32 << 20), usable))
        grid_spec = pltpu.PrefetchScalarGridSpec(
            num_scalar_prefetch=1,
            grid=(B, n_s),
            in_specs=[
                pl.BlockSpec((1, ts, D), lambda b, s, lang: (b, s, 0)),       # old_x
                pl.BlockSpec((1, ts, D), lambda b, s, lang: (b, s, 0)),       # x
                pl.BlockSpec((L, D, 2 * D), lambda b, s, lang: (0, 0, 0)),    # [share|lang] W, all langs
                pl.BlockSpec((L, D, D), lambda b, s, lang: (0, 0, 0)),        # gate W1, all langs
                pl.BlockSpec((L, 1, D), lambda b, s, lang: (0, 0, 0)),        # gate b1, all langs
                pl.BlockSpec((L, 1, D), lambda b, s, lang: (0, 0, 0)),        # gate w2, all langs
                pl.BlockSpec(memory_space=pltpu.MemorySpace.SMEM),            # gate b2 [L]
            ],
            out_specs=pl.BlockSpec((1, ts, D), lambda b, s, lang: (b, s, 0)),
        )
        return pl.pallas_call(
            _resident_kernel,
            out_shape=jax.ShapeDtypeStruct((B, S, D), x.dtype),
            grid_spec=grid_spec,
            compiler_params=pltpu.CompilerParams(
                dimension_semantics=("parallel", "parallel"),
                vmem_limit_bytes=vmem_bytes),
            cost_estimate=cost,
        )(lang, old_x, x,
          prep["w_x"], prep["w_gate1"], prep["b_gate1"],
          prep["w_gate2"], prep["b_gate2"])

    # --- STREAMED path: per-language weight blocks, permutation inside the pipeline. ---
    # Grid iterates in language-sorted order so consecutive steps reuse the same
    # weight block (Pallas skips the re-DMA); old_x/x/out are fed/written at their
    # ORIGINAL batch positions via order[b] in the index_maps (no HBM gather/scatter).
    order = jnp.argsort(lang).astype(jnp.int32)
    lang_sorted = jnp.take(lang, order).astype(jnp.int32)

    vmem_bytes = int(min(max(str_est, 32 << 20), usable))
    grid_spec = pltpu.PrefetchScalarGridSpec(
        num_scalar_prefetch=2,
        grid=(B, n_s),
        in_specs=[
            pl.BlockSpec((1, ts, D), lambda b, s, order, ls: (order[b], s, 0)),   # old_x
            pl.BlockSpec((1, ts, D), lambda b, s, order, ls: (order[b], s, 0)),   # x
            pl.BlockSpec((1, D, 2 * D), lambda b, s, order, ls: (ls[b], 0, 0)),   # [share|lang] W
            pl.BlockSpec((1, D, D), lambda b, s, order, ls: (ls[b], 0, 0)),       # gate W1
            pl.BlockSpec((1, 1, D), lambda b, s, order, ls: (ls[b], 0, 0)),       # gate b1
            pl.BlockSpec((1, 1, D), lambda b, s, order, ls: (ls[b], 0, 0)),       # gate w2
            pl.BlockSpec(memory_space=pltpu.MemorySpace.SMEM),                    # gate b2 [L]
        ],
        out_specs=pl.BlockSpec((1, ts, D), lambda b, s, order, ls: (order[b], s, 0)),
    )
    # TODO(synk): for very large D on v7x, single-buffer the weight specs
    # (pipeline_mode=pl.Buffered(1)) and/or tile the 2D output dim of w_x.
    return pl.pallas_call(
        _streamed_kernel,
        out_shape=jax.ShapeDtypeStruct((B, S, D), x.dtype),
        grid_spec=grid_spec,
        compiler_params=pltpu.CompilerParams(
            dimension_semantics=("parallel", "parallel"),
            vmem_limit_bytes=vmem_bytes),
        cost_estimate=cost,
    )(order, lang_sorted, old_x, x,
      prep["w_x"], prep["w_gate1"], prep["b_gate1"],
      prep["w_gate2"], prep["b_gate2"])


# ----------------------------------------------------------------------------
# Parameters (mirroring the PyTorch module; weights pre-transposed) + reference
# ----------------------------------------------------------------------------

def init_params(key, size, lang_num):
    ks = jax.random.split(key, 6)
    scale = 1.0 / jnp.sqrt(size)
    return {
        "w_share": jax.random.normal(ks[0], (size, size), jnp.float32) * scale,
        "w_lang": jax.random.normal(ks[1], (lang_num, size, size), jnp.float32) * scale,
        "gate_w1": jax.random.normal(ks[2], (lang_num, size, size), jnp.float32) * scale,
        "gate_b1": jax.random.normal(ks[3], (lang_num, 1, size), jnp.float32) * scale,
        "gate_w2": jax.random.normal(ks[4], (lang_num, 1, size), jnp.float32) * scale,
        "gate_b2": jax.random.normal(ks[5], (lang_num,), jnp.float32) * scale,
    }


def prepare_params(params, weight_dtype=jnp.bfloat16):
    """One-time weight prep: bf16 cast + [share | lang] concat into [L, D, 2D]."""
    D = params["w_share"].shape[0]
    L = params["w_lang"].shape[0]
    w_share = params["w_share"].astype(weight_dtype)
    w_lang = params["w_lang"].astype(weight_dtype)
    w_x = jnp.concatenate(
        [jnp.broadcast_to(w_share[None], (L, D, D)), w_lang], axis=-1)   # [L, D, 2D]
    return {
        "w_x": w_x,
        "w_gate1": params["gate_w1"].astype(weight_dtype),   # [L, D, D]
        "b_gate1": params["gate_b1"].astype(jnp.float32),    # [L, 1, D]
        "w_gate2": params["gate_w2"].astype(jnp.float32),    # [L, 1, D]
        "b_gate2": params["gate_b2"].astype(jnp.float32),    # [L]
    }


def routing_ref(old_x, x, lang, prep):
    """Plain-JAX reference mirroring the PyTorch forward (same bf16 weights)."""
    D = x.shape[-1]
    wdt = prep["w_x"].dtype
    xb = x.astype(wdt)
    ob = old_x.astype(wdt)

    w_x = prep["w_x"][lang]                                   # [B, D, 2D]
    h = jnp.einsum("bsd,bde->bse", xb, w_x,
                   preferred_element_type=jnp.float32)
    share_h, lang_h = h[..., :D], h[..., D:]

    w1 = prep["w_gate1"][lang]                                # [B, D, D]
    b1 = prep["b_gate1"][lang]                                # [B, 1, D]
    w2 = prep["w_gate2"][lang]                                # [B, 1, D]
    b2 = prep["b_gate2"][lang]                                # [B]
    g = jnp.einsum("bsd,bde->bse", ob, w1,
                   preferred_element_type=jnp.float32) + b1
    g = jnp.maximum(g, 0.0) + old_x
    g2 = jnp.sum(g * w2, axis=-1, keepdims=True) + b2[:, None, None]
    gate = jax.nn.sigmoid(g2)
    return (share_h * (1.0 - gate) + lang_h * gate).astype(x.dtype)


def _check(out, ref, name):
    out = jax.block_until_ready(out)
    max_err = jnp.max(jnp.abs(out.astype(jnp.float32) - ref.astype(jnp.float32)))
    assert jnp.allclose(out, ref, atol=2e-3, rtol=2e-3), (
        f"{name}: mismatch, max abs err = {max_err}")


if __name__ == "__main__":
    key = jax.random.PRNGKey(0)
    k_old, k_x, k_p, k_old2, k_x2 = jax.random.split(key, 5)

    # Small lane-aligned shapes consistent with the module.
    B, S, D, L = 4, 16, 128, 3
    params = init_params(k_p, D, L)
    prep = prepare_params(params, weight_dtype=jnp.bfloat16)

    old_x = jax.random.normal(k_old, (B, S, D), jnp.float32)
    x = jax.random.normal(k_x, (B, S, D), jnp.float32)
    lang = jnp.array([2, 0, 1, 0], dtype=jnp.int32)
    ref = routing_ref(old_x, x, lang, prep)

    # 1) Resident-weights path (auto-selected: all L weight sets fit in VMEM).
    _check(routing_layer(old_x, x, lang, prep), ref, "resident")

    # 2) Streamed path with in-pipeline batch permutation (forced, to exercise it).
    _check(routing_layer(old_x, x, lang, prep, force_streamed=True), ref, "streamed")

    # 3) Ragged sequence length (exercises the cdiv grid + padded tail tile).
    B2, S2 = 2, 520
    old_x2 = jax.random.normal(k_old2, (B2, S2, D), jnp.float32)
    x2 = jax.random.normal(k_x2, (B2, S2, D), jnp.float32)
    lang2 = jnp.array([1, 2], dtype=jnp.int32)
    ref2 = routing_ref(old_x2, x2, lang2, prep)
    _check(routing_layer(old_x2, x2, lang2, prep), ref2, "ragged")

    print("KERNEL_OK")
</pallas_src>

<mosaic_0001>
module attributes {stable_mosaic.version = 11 : i64} {
  func.func @_resident_kernel(%arg0: i32, %arg1: i32, %arg2: memref<4xi32, #tpu.memory_space<smem>>, %arg3: memref<1x16x128xf32, #tpu.memory_space<vmem>>, %arg4: memref<1x16x128xf32, #tpu.memory_space<vmem>>, %arg5: memref<3x128x256xbf16, #tpu.memory_space<vmem>>, %arg6: memref<3x128x128xbf16, #tpu.memory_space<vmem>>, %arg7: memref<3x1x128xf32, #tpu.memory_space<vmem>>, %arg8: memref<3x1x128xf32, #tpu.memory_space<vmem>>, %arg9: memref<3xf32, #tpu.memory_space<smem>>, %arg10: memref<1x16x128xf32, #tpu.memory_space<vmem>>) attributes {dimension_semantics = [#tpu.dimension_semantics<parallel>, #tpu.dimension_semantics<parallel>], iteration_bounds = array<i64: 4, 1>, scalar_prefetch = 1 : i64, scratch_operands = 0 : i64, tpu.core_type = #tpu.core_type<tc>, window_params = [{transform_indices = @transform_0, window_bounds = array<i64: 1, 16, 128>}, {transform_indices = @transform_1, window_bounds = array<i64: 1, 16, 128>}, {pipeline_mode = #tpu.pipeline_mode<synchronous>, transform_indices = @transform_2, window_bounds = array<i64: 3, 128, 256>}, {pipeline_mode = #tpu.pipeline_mode<synchronous>, transform_indices = @transform_3, window_bounds = array<i64: 3, 128, 128>}, {pipeline_mode = #tpu.pipeline_mode<synchronous>, transform_indices = @transform_4, window_bounds = array<i64: 3, 1, 128>}, {pipeline_mode = #tpu.pipeline_mode<synchronous>, transform_indices = @transform_5, window_bounds = array<i64: 3, 1, 128>}, {transform_indices = @transform_6, window_bounds = array<i64: 3>}, {transform_indices = @transform_7, window_bounds = array<i64: 1, 16, 128>}]} {
    %0 = arith.index_cast %arg0 : i32 to index
    %1 = memref.load %arg2[%0] : memref<4xi32, #tpu.memory_space<smem>>
    %c0 = arith.constant 0 : index
    %c0_0 = arith.constant 0 : index
    %c0_1 = arith.constant 0 : index
    %2 = vector.load %arg4[%c0, %c0_0, %c0_1] : memref<1x16x128xf32, #tpu.memory_space<vmem>>, vector<1x16x128xf32>
    %3 = vector.shape_cast %2 : vector<1x16x128xf32> to vector<16x128xf32>
    %c0_2 = arith.constant 0 : index
    %c0_3 = arith.constant 0 : index
    %c0_4 = arith.constant 0 : index
    %4 = vector.load %arg3[%c0_2, %c0_3, %c0_4] : memref<1x16x128xf32, #tpu.memory_space<vmem>>, vector<1x16x128xf32>
    %5 = vector.shape_cast %4 : vector<1x16x128xf32> to vector<16x128xf32>
    %6 = arith.index_cast %1 : i32 to index
    %c0_5 = arith.constant 0 : index
    %c0_6 = arith.constant 0 : index
    %7 = vector.load %arg5[%6, %c0_5, %c0_6] : memref<3x128x256xbf16, #tpu.memory_space<vmem>>, vector<1x128x256xbf16>
    %8 = vector.shape_cast %7 : vector<1x128x256xbf16> to vector<128x256xbf16>
    %9 = arith.index_cast %1 : i32 to index
    %c0_7 = arith.constant 0 : index
    %c0_8 = arith.constant 0 : index
    %10 = vector.load %arg6[%9, %c0_7, %c0_8] : memref<3x128x128xbf16, #tpu.memory_space<vmem>>, vector<1x128x128xbf16>
    %11 = vector.shape_cast %10 : vector<1x128x128xbf16> to vector<128x128xbf16>
    %12 = arith.index_cast %1 : i32 to index
    %c0_9 = arith.constant 0 : index
    %c0_10 = arith.constant 0 : index
    %13 = vector.load %arg7[%12, %c0_9, %c0_10] : memref<3x1x128xf32, #tpu.memory_space<vmem>>, vector<1x1x128xf32>
    %14 = vector.shape_cast %13 : vector<1x1x128xf32> to vector<1x128xf32>
    %15 = arith.index_cast %1 : i32 to index
    %c0_11 = arith.constant 0 : index
    %c0_12 = arith.constant 0 : index
    %16 = vector.load %arg8[%15, %c0_11, %c0_12] : memref<3x1x128xf32, #tpu.memory_space<vmem>>, vector<1x1x128xf32>
    %17 = vector.shape_cast %16 : vector<1x1x128xf32> to vector<1x128xf32>
    %18 = arith.index_cast %1 : i32 to index
    %19 = memref.load %arg9[%18] : memref<3xf32, #tpu.memory_space<smem>>
    %20 = arith.truncf %3 : vector<16x128xf32> to vector<16x128xbf16>
    %cst = arith.constant dense<0.000000e+00> : vector<16x256xf32>
    %21 = tpu.matmul %20, %8, %cst {dimension_numbers = #tpu.dot_dimension_numbers<[1], [0], [0], [1], [0, 0, 1, 1], [], []>} : vector<16x128xbf16>, vector<128x256xbf16>, vector<16x256xf32> -> vector<16x256xf32>
    %22 = vector.extract_strided_slice %21 {offsets = [0, 0], sizes = [16, 128], strides = [1, 1]} : vector<16x256xf32> to vector<16x128xf32>
    %23 = vector.extract_strided_slice %21 {offsets = [0, 128], sizes = [16, 128], strides = [1, 1]} : vector<16x256xf32> to vector<16x128xf32>
    %24 = arith.truncf %5 : vector<16x128xf32> to vector<16x128xbf16>
    %cst_13 = arith.constant dense<0.000000e+00> : vector<16x128xf32>
    %25 = tpu.matmul %24, %11, %cst_13 {dimension_numbers = #tpu.dot_dimension_numbers<[1], [0], [0], [1], [0, 0, 1, 1], [], []>} : vector<16x128xbf16>, vector<128x128xbf16>, vector<16x128xf32> -> vector<16x128xf32>
    %26 = vector.broadcast %14 : vector<1x128xf32> to vector<16x128xf32>
    %27 = arith.addf %25, %26 : vector<16x128xf32>
    %cst_14 = arith.constant 0.000000e+00 : f32
    %28 = vector.broadcast %cst_14 : f32 to vector<16x128xf32>
    %29 = arith.maximumf %27, %28 : vector<16x128xf32>
    %30 = arith.addf %29, %5 : vector<16x128xf32>
    %31 = vector.broadcast %17 : vector<1x128xf32> to vector<16x128xf32>
    %32 = arith.mulf %30, %31 : vector<16x128xf32>
    %cst_15 = arith.constant dense<0.000000e+00> : vector<16xf32>
    %33 = vector.multi_reduction <add>, %32, %cst_15 [1] : vector<16x128xf32> to vector<16xf32>
    %34 = vector.shape_cast %33 : vector<16xf32> to vector<16x1xf32>
    %35 = vector.broadcast %19 : f32 to vector<16x1xf32>
    %36 = arith.addf %34, %35 : vector<16x1xf32>
    %37 = arith.negf %36 : vector<16x1xf32>
    %38 = math.exp %37 : vector<16x1xf32>
    %cst_16 = arith.constant 1.000000e+00 : f32
    %39 = vector.broadcast %cst_16 : f32 to vector<16x1xf32>
    %40 = arith.addf %39, %38 : vector<16x1xf32>
    %41 = arith.divf %39, %40 : vector<16x1xf32>
    %42 = arith.subf %23, %22 : vector<16x128xf32>
    %43 = vector.broadcast %41 : vector<16x1xf32> to vector<16x128xf32>
    %44 = arith.mulf %43, %42 : vector<16x128xf32>
    %45 = arith.addf %22, %44 : vector<16x128xf32>
    %c0_17 = arith.constant 0 : index
    %c0_18 = arith.constant 0 : index
    %c0_19 = arith.constant 0 : index
    %46 = vector.load %arg10[%c0_17, %c0_18, %c0_19] : memref<1x16x128xf32, #tpu.memory_space<vmem>>, vector<1x16x128xf32>
    %47 = vector.shape_cast %46 : vector<1x16x128xf32> to vector<16x128xf32>
    %48 = vector.shape_cast %45 : vector<16x128xf32> to vector<1x16x128xf32>
    tpu.vector_store %arg10[%c0_17, %c0_18, %c0_19], %48 {strides = array<i32>} : memref<1x16x128xf32, #tpu.memory_space<vmem>>, vector<1x16x128xf32>,
    return
  }
  func.func @transform_0(%arg0: i32, %arg1: i32, %arg2: memref<4xi32, #tpu.memory_space<smem>>) -> (i32, i32, i32) {
    %c0_i32 = arith.constant 0 : i32
    %c0_i32_0 = arith.constant 0 : i32
    return %arg0, %arg1, %c0_i32 : i32, i32, i32
  }
  func.func @transform_1(%arg0: i32, %arg1: i32, %arg2: memref<4xi32, #tpu.memory_space<smem>>) -> (i32, i32, i32) {
    %c0_i32 = arith.constant 0 : i32
    %c0_i32_0 = arith.constant 0 : i32
    return %arg0, %arg1, %c0_i32 : i32, i32, i32
  }
  func.func @transform_2(%arg0: i32, %arg1: i32, %arg2: memref<4xi32, #tpu.memory_space<smem>>) -> (i32, i32, i32) {
    %c0_i32 = arith.constant 0 : i32
    %c0_i32_0 = arith.constant 0 : i32
    %c0_i32_1 = arith.constant 0 : i32
    %c0_i32_2 = arith.constant 0 : i32
    return %c0_i32, %c0_i32_0, %c0_i32_1 : i32, i32, i32
  }
  func.func @transform_3(%arg0: i32, %arg1: i32, %arg2: memref<4xi32, #tpu.memory_space<smem>>) -> (i32, i32, i32) {
    %c0_i32 = arith.constant 0 : i32
    %c0_i32_0 = arith.constant 0 : i32
    %c0_i32_1 = arith.constant 0 : i32
    %c0_i32_2 = arith.constant 0 : i32
    return %c0_i32, %c0_i32_0, %c0_i32_1 : i32, i32, i32
  }
  func.func @transform_4(%arg0: i32, %arg1: i32, %arg2: memref<4xi32, #tpu.memory_space<smem>>) -> (i32, i32, i32) {
    %c0_i32 = arith.constant 0 : i32
    %c0_i32_0 = arith.constant 0 : i32
    %c0_i32_1 = arith.constant 0 : i32
    %c0_i32_2 = arith.constant 0 : i32
    return %c0_i32, %c0_i32_0, %c0_i32_1 : i32, i32, i32
  }
  func.func @transform_5(%arg0: i32, %arg1: i32, %arg2: memref<4xi32, #tpu.memory_space<smem>>) -> (i32, i32, i32) {
    %c0_i32 = arith.constant 0 : i32
    %c0_i32_0 = arith.constant 0 : i32
    %c0_i32_1 = arith.constant 0 : i32
    %c0_i32_2 = arith.constant 0 : i32
    return %c0_i32, %c0_i32_0, %c0_i32_1 : i32, i32, i32
  }
  func.func @transform_6(%arg0: i32, %arg1: i32, %arg2: memref<4xi32, #tpu.memory_space<smem>>) -> i32 {
    %c0_i32 = arith.constant 0 : i32
    %c0_i32_0 = arith.constant 0 : i32
    return %c0_i32 : i32
  }
  func.func @transform_7(%arg0: i32, %arg1: i32, %arg2: memref<4xi32, #tpu.memory_space<smem>>) -> (i32, i32, i32) {
    %c0_i32 = arith.constant 0 : i32
    %c0_i32_0 = arith.constant 0 : i32
    return %arg0, %arg1, %c0_i32 : i32, i32, i32
  }
}

</mosaic_0001>

<bundles_post_ra>
// kernel: tpu_custom_call.1
= control target key start
LH: loop header
LB: loop body
LE: loop exit
PB: predicated region body
PF: predicated region fallthrough
CT: control target
= control target key end

     0   :  { %s1464_s30 = smov [#allocation3]   ;;  %s1792_s0 = inlined_call_operand.hbm [shape: s32[4], index: 0, kind: input, shape index: {}]   ;;  %s1793_s1 = inlined_call_operand.hbm [shape: f32[4,16,128], index: 1, kind: input, shape index: {}]   ;;  %s1794_s2 = inlined_call_operand.hbm [shape: f32[4,16,128], index: 2, kind: input, shape index: {}]   ;;  %s1795_s3 = inlined_call_operand.hbm [shape: bf16[3,128,256], index: 3, kind: input, shape index: {}]   ;;  %s1796_s4 = inlined_call_operand.hbm [shape: bf16[3,128,128], index: 4, kind: input, shape index: {}]   ;;  %s1797_s5 = inlined_call_operand.vmem [shape: f32[3,1,128], index: 5, kind: input, shape index: {}]   ;;  %s1798_s6 = inlined_call_operand.hbm [shape: f32[3,1,128], index: 6, kind: input, shape index: {}]   ;;  %s1799_s7 = inlined_call_operand.vmem [shape: f32[3], index: 7, kind: input, shape index: {}]   ;;  %s1800_s8 = inlined_call_operand.hbm [shape: f32[4,16,128], index: 8, kind: output, shape index: {}]  }
   0x1   :  { %1808 = sst [smem:[#allocation27_spill]] %s1795_s3  ;;  %s14_s29 = sshll.u32 %s1792_s0, 4  ;;  %s15_s29 = int_to_ptr.hbm [resolvable:$true] %s14_s29 }
   0x2   :  { %1809 = sst [smem:[#allocation28_spill]] %s1796_s4 }
   0x3   :  { %1810 = sst [smem:[#allocation29_spill]] %s1798_s6 }
   0x4   :  { %1811 = sst [smem:[#allocation30_spill]] %s1799_s7 }
   0x5   :  { %17 = dma.hbm_to_smem %s15_s29, 16, %s1464_s30, [#allocation2] }
   0x6   :  { %1414 = dma.done.wait [#allocation2], 16 }
   0x7   :  { %1415 = vsyncadd [#allocation2], 4294967280 }
   0x8   :  { %20 = sfence }
   0x9   :  { %21 = vsyncpa [#allocation5], 0 }
   0xa   :  { %23 = vsyncpa [#allocation5 + $0x1], 0 }
   0xb   :  { %24 = vsyncpa [#allocation9], 0 }
   0xc   :  { %26 = vsyncpa [#allocation9 + $0x1], 0 }
   0xd   :  { %27 = vsyncpa [#allocation12], 0 }
   0xe   :  { %28 = vsyncpa [#allocation7], 0 }
   0xf   :  { %29 = vsyncpa [#allocation6], 0 }
  0x10   :  { %31 = vsyncpa [#allocation6 + $0x1], 0  ;;  %s1525_s9 = smov 0   ;;  %s1527_s10 = smov 0  }
  0x11   :  { %s1529_s11 = smov 0   ;;  %s1531_s0 = smov 0  }
  0x12   :  { %s1533_s12 = smov 0   ;;  %s1535_s13 = smov 0  }
  0x13 LB: > { %1812 = sst [smem:[#allocation23_spill]] %s1450_s11  ;;  %s1556_s14 = sadd.s32 4294967295, %s1462_s13   ;;  %s1462_s13 = sphi %s1535_s13, %s37_s13   ;;  %s1458_s12 = sphi %s1533_s12, %s1831_s12   ;;  %s1454_s0 = sphi %s1531_s0, %s1830_s0   ;;  %s1450_s11 = sphi %s1529_s11, %s1829_s11   ;;  %s1446_s10 = sphi %s1527_s10, %s1833_s10   ;;  %s1442_s9 = sphi %s1525_s9, %s1832_s9  }
  0x14   : > { %1813 = sst [smem:[#allocation24_spill]] %s1458_s12  ;;  %s901_s15 = sadd.s32 4294967294, %s1462_s13  }
  0x15   : > { %p71_p0 = scmp.ne.s32.totalorder %s1446_s10, %s1442_s9  ;;  %p72_p1 = scmp.eq.s32.totalorder %s1556_s14, 0 }
  0x16   : > { %p230_p2 = scmp.eq.s32.totalorder %s1556_s14, 3  ;;  %p236_p3 = scmp.eq.s32.totalorder %s901_s15, 3 }
  0x17   : > { %p1565_p4 = por %p72_p1, %p71_p0  ;;  %p902_p5 = scmp.ge.s32.totalorder %s1462_s13, 1 }
  0x18   : > { %p1570_p6 = por %p236_p3, %p71_p0  ;;  %p243_p7 = scmp.lt.s32.totalorder %s1462_s13, 5 }
  0x19   : > { %s1816_s3 = sld [smem:[#allocation27_spill]]  ;;  %s1465_s22 = smov [#allocation10]  }
  0x1a   : > { %p1578_p8 = pnand %p902_p5, %p243_p7  ;;  %s256_s23 = sshll.u32 %s1465_s22, 4  ;;  %s257_s23 = int_to_ptr.vmem [resolvable:$true] %s256_s23 }
  0x1b   : > { %s1819_s4 = sld [smem:[#allocation28_spill]]  ;;  %s1801_s28 = smov 128  }
  0x1c   : > { %p1080_p9 = pneg %p1578_p8  ;;  %s1803_s29 = smov 8  }
  0x1d   : > { %s1468_s30 = smov [#allocation11]   ;;  %s1469_s18 = smov 64  }
  0x1e   : > { %p1586_p10 = pnand %p1080_p9, %p72_p1  ;;  %s270_s15 = sshll.u32 %s1468_s30, 4  ;;  %s271_s15 = int_to_ptr.vmem [resolvable:$true] %s270_s15 }
  0x1f   : > { %s254_s20 = sshll.u32 %s1816_s3, 4  ;;  %s1470_s19 = smov 4   ;;  %s255_s20 = int_to_ptr.hbm [resolvable:$true] %s254_s20 }
  0x20   : > { %1083 = dma.hbm_to_vmem [thread:$0]  (!%p1586_p10), %s255_s20, 6144, %s257_s23, [#allocation9], %s1801_s28, %s1801_s28, %s1803_s29  }
  0x21   : > { %s268_s27 = sshll.u32 %s1819_s4, 4  ;;  %s1820_s6 = sld [smem:[#allocation29_spill]]  ;;  %s269_s27 = int_to_ptr.hbm [resolvable:$true] %s268_s27 }
  0x22   : > { %1086 = dma.hbm_to_vmem [thread:$0]  (!%p1586_p10), %s269_s27, 3072, %s271_s15, [#allocation12], %s1469_s18, %s1469_s18, %s1470_s19  }
  0x23   : > { %s1471_s20 = smov [#allocation13]   ;;  %s1821_s7 = sld [smem:[#allocation30_spill]] }
  0x24   : > { %s287_s23 = sshll.u32 %s1471_s20, 4  ;;  %s1472_s3 = smov 16   ;;  %s288_s23 = int_to_ptr.vmem [resolvable:$true] %s287_s23 }
  0x25   : > { %s1473_s27 = smov 1   ;;  %s1474_s15 = smov [#allocation14]  }
  0x26   : > { %s49_s18 = sadd.s32 1, %s1458_s12  ;;  %s58_s19 = sadd.s32 1, %s1450_s11 }
  0x27   : > { %s285_s26 = sshll.u32 %s1820_s6, 4  ;;  %p51_p11 = scmp.ge.s32.totalorder %s49_s18, 4  ;;  %s286_s26 = int_to_ptr.hbm [resolvable:$true] %s285_s26 }
  0x28   : > { %1089 = dma.hbm_to_vmem [thread:$0]  (!%p1586_p10), %s286_s26, 48, %s288_s23, [#allocation12], %s1472_s3, %s1472_s3, %s1473_s27  }
  0x29   : > { %s300_s29 = sshll.u32 %s1821_s7, 4  ;;  %p65_p12 = scmp.ne.s32.totalorder %s1450_s11, %s1446_s10  ;;  %s301_s29 = int_to_ptr.vmem [resolvable:$true] %s300_s29 }
  0x2a   : > { %1092 = dma.vmem_to_smem (!%p1586_p10), %s301_s29, 16, %s1474_s15, [#allocation7]  }
  0x2b   : > { %p66_p13 = scmp.eq.s32.totalorder %s1462_s13, 0  ;;  %p1108_p0 = scmp.lt.s32.totalorder %s1462_s13, 4 }
  0x2c   : > { %s1835_s18 = smov (%p51_p11, %s49_s18), 0  ;;  %p1624_p5 = por %p230_p2, %p65_p12 }
  0x2d   : > { %1822 = sst [smem:[#allocation25_spill]] %s1835_s18  ;;  %p1618_p3 = por %p66_p13, %p65_p12 }
  0x2e   : > { %s53_s24 = ssub.s32 %s1458_s12, %s1835_s18  ;;  %s311_s29 = sand.u32 1, %s1450_s11  }
  0x2f   : > { %p56_p7 = scmp.eq.s32.totalorder %s53_s24, 0  ;;  %s908_s22 = sshll.u32 %s311_s29, 4 }
  0x30   : > { %s1029_s25 = sshll.u32 %s1458_s12, 4  ;;  %s315_s15 = scalar_lea.vmem [#allocation4], %s908_s22 }
  0x31   : > { %s1633_s26 = scalar_select %p56_p7, %s1450_s11, %s58_s19  }
  0x32   : > { %s322_s30 = scalar_lea.hbm %s1793_s1, %s1029_s25  ;;  %s325_s4 = sshll.u32 %s315_s15, 4  ;;  %s326_s4 = int_to_ptr.vmem [resolvable:$true] %s325_s4 }
  0x33   : > { %1825 = sst [smem:[#allocation26_spill]] %s1633_s26  ;;  %s323_s27 = sshll.u32 %s322_s30, 4  ;;  %s324_s27 = int_to_ptr.hbm [resolvable:$true] %s323_s27 }
  0x34   : > { %p1094_p2 = pnand %p1108_p0, %p1618_p3  ;;  %s346_s24 = scalar_lea.hbm %s1794_s2, %s1029_s25 }
  0x35   : > { %s339_s18 = scalar_lea.vmem [#allocation8], %s908_s22  ;;  %s347_s12 = sshll.u32 %s346_s24, 4  ;;  %s348_s12 = int_to_ptr.hbm [resolvable:$true] %s347_s12 }
  0x36   : > { %s349_s19 = sshll.u32 %s339_s18, 4  ;;  %s312_s26 = scalar_lea.sflag [#allocation5], %s311_s29  ;;  %s350_s19 = int_to_ptr.vmem [resolvable:$true] %s349_s19 }
  0x37   : > { %s1826_s11 = smov 8   ;;  %s1827_s20 = smov 128  }
  0x38   : > { %1096 = dma.hbm_to_vmem [thread:$0]  (!%p1094_p2), %s324_s27, 256, %s326_s4, %s312_s26, %s1827_s20, %s1827_s20, %s1826_s11  }
  0x39   : > { %s335_s23 = sand.u32 1, %s1462_s13   ;;  %361 = sbr.rel (%p1578_p8) target bundleno = 416 (0x1a0), region = 48 }
  0x3a   : > { %s336_s30 = scalar_lea.sflag [#allocation9], %s335_s23  ;;  %s1655_s6 = sand.u32 (!%p1578_p8), 1, %s1446_s10  }
  0x3b   : > { %1099 = dma.hbm_to_vmem [thread:$0]  (!%p1094_p2), %s348_s12, 256, %s350_s19, %s336_s30, %s1827_s20, %s1827_s20, %s1826_s11  }
  0x3c   : > { %s1658_s7 = sshll.u32 (!%p1578_p8), %s1655_s6, 4  ;;  %s364_s4 = scalar_lea.sflag (!%p1578_p8), [#allocation5], %s1655_s6 }
  0x3d   : > { %s367_s18 = scalar_lea.vmem (!%p1578_p8), [#allocation4], %s1658_s7 }
  0x3e   : > { %1417 = dma.done.wait (%p1565_p4), %s364_s4, 256  }
  0x3f   : > { %1419 = vsyncadd (%p1565_p4), %s364_s4, 4294967040  ;;  %s373_s11 = sand.u32 1, %s1556_s14   ;;  %s377_s21 = scalar_lea.vmem [#allocation8], %s1658_s7 }
  0x40   : > { %s374_s12 = scalar_lea.sflag [#allocation9], %s373_s11 }
  0x41   : > { %1421 = dma.done.wait (%p1565_p4), %s374_s12, 256  }
  0x42   : > { %1423 = vsyncadd (%p1565_p4), %s374_s12, 4294967040 }
  0x43   : > { %1425 = dma.done.wait (%p72_p1), [#allocation9], 6144  }
  0x44   : > { %1427 = vsyncadd (%p72_p1), [#allocation9], 4294961152 }
  0x45   : > { %1429 = dma.done.wait (%p72_p1), [#allocation12], 3120  }
  0x46   : > { %1431 = vsyncadd (%p72_p1), [#allocation12], 4294964176 }
  0x47   : > { %1433 = dma.done.wait (%p72_p1), [#allocation7], 16  }
  0x48   : > { %1435 = vsyncadd (%p72_p1), [#allocation7], 4294967280 }
  0x49   : > { %403 = sfence }
  0x4a   : > { %s1685_s16 = sld [smem:[#allocation3 + %s1454_s0]]  ;;  %v441_v32 = vld [vmem:[%s367_s18] sm:$0xff]  ;;  %v442_v33 = vld [vmem:[%s367_s18 + $0x8] sm:$0xff]  ;;  %s1057_s23 = sshll.u32 %s1454_s0, 4 }
  0x4b   : > { %v595_v34 = vpack.c.bf16 %v442_v33, %v441_v32  ;;  %v439_v59 = vld [vmem:[%s377_s21] sm:$0xff]  ;;  %v440_v60 = vld [vmem:[%s377_s21 + $0x8] sm:$0xff]  ;;  %s737_s18 = scalar_lea.hbm %s1800_s8, %s1057_s23  ;;  %s434_s11 = scalar_lea.vmem [#allocation15], %s1658_s7 }
  0x4c   : > { %v486_v61 = vpack.c.bf16 %v440_v60, %v439_v59  ;;  %s738_s12 = sshll.u32 %s434_s11, 4  ;;  %s740_s0 = sshll.u32 %s737_s18, 4  ;;  %s739_s12 = int_to_ptr.vmem [resolvable:$true] %s738_s12  ;;  %s741_s0 = int_to_ptr.hbm [resolvable:$true] %s740_s0 }
  0x4d   : > { %s724_s21 = scalar_lea.sflag [#allocation6], %s1655_s6  ;;  %s1376_s7 = sshra.s32 %s741_s0, 4  ;;  %s1377_s7 = int_to_ptr.hbm [resolvable:$true] %s1376_s7 }
  0x4e   : > { %p1383_p9 = scmp.lt.s32.totalorder %s1377_s7, %s1800_s8 }
  0x50   : > { %s1031_s28 = sshll.u32 %s1685_s16, 7  ;;  %s1048_s29 = sshll.u32 %s1685_s16, 6 }
  0x51   : > { %s1689_s22 = scalar_lea.vmem [#allocation11], %s1048_s29  ;;  %s1693_s25 = scalar_lea.vmem [#allocation10], %s1031_s28 }
  0x52   : > { %v1056_v0 = vld [vmem:[%s1689_s22 + $0x38] sm:$0xff]  ;;  %v1055_v1 = vld [vmem:[%s1689_s22 + $0x30] sm:$0xff]  ;;  %v976_v8 = vld [vmem:[%s1693_s25 + $0x60] sm:$0xf]  ;;  %s481_s27 = scalar_lea.vmem %s1797_s5, %s1685_s16  ;;  %s483_s15 = scalar_lea.vmem [#allocation13], %s1685_s16 }
  0x53   : > { %647 = vmatpush.bf16.msra.mxu2 %v1056_v0  ;;  %v984_v2 = vld [vmem:[%s1693_s25 + $0x70] sm:$0xf]  ;;  %v1047_v3 = vld [vmem:[%s1693_s25 + $0x74] sm:$0xf0]  ;;  %v1046_v4 = vld [vmem:[%s1693_s25 + $0x74] sm:$0xf] }
  0x54   : > { %v986_v5 = vld [vmem:[%s1693_s25 + $0x78] sm:$0xf0]  ;;  %v985_v6 = vor.u32 %v1047_v3, %v984_v2  ;;  %v1045_v9 = vld [vmem:[%s1693_s25 + $0x64] sm:$0xf0]  ;;  %v1044_v10 = vld [vmem:[%s1693_s25 + $0x64] sm:$0xf] }
  0x55   : > { %v989_v7 = vor.u32 %v1046_v4, %v986_v5  ;;  %v978_v11 = vld [vmem:[%s1693_s25 + $0x68] sm:$0xf0]  ;;  %v977_v13 = vor.u32 %v1045_v9, %v976_v8  ;;  %v968_v15 = vld [vmem:[%s1693_s25 + $0x50] sm:$0xf]  ;;  %v1043_v16 = vld [vmem:[%s1693_s25 + $0x54] sm:$0xf0] }
  0x56   : > { %v1054_v12 = vld [vmem:[%s1689_s22 + $0x28] sm:$0xff]  ;;  %567 = vmatpush.bf16.msra.mxu0 %v985_v6  ;;  %v981_v14 = vor.u32 %v1044_v10, %v978_v11  ;;  %v1042_v17 = vld [vmem:[%s1693_s25 + $0x54] sm:$0xf]  ;;  %v970_v18 = vld [vmem:[%s1693_s25 + $0x58] sm:$0xf0]  ;;  %v969_v20 = vor.u32 %v1043_v16, %v968_v15  ;;  %s485_s20 = sld [smem:[#allocation14 + %s1685_s16]] }
  0x57   : > { %648 = vmatpush.bf16.msra.mxu2 %v1055_v1  ;;  %581 = vmatpush.bf16.msra.mxu1 %v989_v7  ;;  %v1053_v19 = vld [vmem:[%s1689_s22 + $0x20] sm:$0xff]  ;;  %v973_v21 = vor.u32 %v1042_v17, %v970_v18  ;;  %v1041_v23 = vld [vmem:[%s1693_s25 + $0x44] sm:$0xf0]  ;;  %v962_v25 = vld [vmem:[%s1693_s25 + $0x48] sm:$0xf0]  ;;  %s1378_s16 = scalar_lea.hbm %s1377_s7, 16 }
  0x58   : > { %v960_v22 = vld [vmem:[%s1693_s25 + $0x40] sm:$0xf]  ;;  %v1040_v24 = vld [vmem:[%s1693_s25 + $0x44] sm:$0xf]  ;;  %v1052_v26 = vld [vmem:[%s1689_s22 + $0x18] sm:$0xff]  ;;  %p1379_p1 = scmp.ne.s32.totalorder %s1377_s7, %s1378_s16 }
  0x59   : > { %v961_v27 = vor.u32 %v1041_v23, %v960_v22  ;;  %v965_v28 = vor.u32 %v1040_v24, %v962_v25  ;;  %v1051_v29 = vld [vmem:[%s1689_s22 + $0x10] sm:$0xff]  ;;  %v1050_v30 = vld [vmem:[%s1689_s22 + $0x8] sm:$0xff]  ;;  %v1049_v31 = vld [vmem:[%s1689_s22] sm:$0xff]  ;;  %s1382_s22 = scalar_lea.hbm %s1800_s8, 64 }
  0x5a   : > { %568 = vmatpush.bf16.msra.mxu0 %v977_v13  ;;  %v952_v35 = vld [vmem:[%s1693_s25 + $0x30] sm:$0xf]  ;;  %v1039_v36 = vld [vmem:[%s1693_s25 + $0x34] sm:$0xf0]  ;;  %v1038_v37 = vld [vmem:[%s1693_s25 + $0x34] sm:$0xf]  ;;  %p1380_p4 = pnand %p1379_p1, %p1624_p5  ;;  %p1384_p10 = scmp.lt.s32.totalorder %s1382_s22, %s1378_s16 }
  0x5b   : > { %649 = vmatpush.bf16.msra.mxu2 %v1054_v12  ;;  %582 = vmatpush.bf16.msra.mxu1 %v981_v14  ;;  %v953_v38 = vor.u32 %v1039_v36, %v952_v35  ;;  %v954_v39 = vld [vmem:[%s1693_s25 + $0x38] sm:$0xf0]  ;;  %v944_v41 = vld [vmem:[%s1693_s25 + $0x20] sm:$0xf]  ;;  %v1037_v42 = vld [vmem:[%s1693_s25 + $0x24] sm:$0xf0] }
  0x5c   : > { %v957_v40 = vor.u32 %v1038_v37, %v954_v39  ;;  %v1036_v43 = vld [vmem:[%s1693_s25 + $0x24] sm:$0xf]  ;;  %v945_v44 = vor.u32 %v1037_v42, %v944_v41  ;;  %v946_v45 = vld [vmem:[%s1693_s25 + $0x28] sm:$0xf0]  ;;  %v936_v47 = vld [vmem:[%s1693_s25 + $0x10] sm:$0xf]  ;;  %v674_v10 = vstv %s485_s20  ;;  %p1381_p8 = pneg %p1380_p4  ;;  %p1385_p11 = por %p1384_p10, %p1383_p9 }
  0x5d   : > { %v949_v46 = vor.u32 %v1036_v43, %v946_v45  ;;  %v1035_v48 = vld [vmem:[%s1693_s25 + $0x14] sm:$0xf0]  ;;  %v1034_v49 = vld [vmem:[%s1693_s25 + $0x14] sm:$0xf]  ;;  %v938_v51 = vld [vmem:[%s1693_s25 + $0x18] sm:$0xf0] }
  0x5e   : > { %569 = vmatpush.bf16.msra.mxu0 %v969_v20  ;;  %v937_v50 = vor.u32 %v1035_v48, %v936_v47  ;;  %v941_v52 = vor.u32 %v1034_v49, %v938_v51  ;;  %v928_v53 = vld [vmem:[%s1693_s25] sm:$0xf]  ;;  %v1033_v54 = vld [vmem:[%s1693_s25 + $0x4] sm:$0xf0]  ;;  %v1032_v55 = vld [vmem:[%s1693_s25 + $0x4] sm:$0xf]  ;;  %p1386_p12 = pnand %p1385_p11, %p1381_p8 }
  0x5f   : > { %650 = vmatpush.bf16.msra.mxu2 %v1053_v19  ;;  %583 = vmatpush.bf16.msra.mxu1 %v973_v21  ;;  %v929_v56 = vor.u32 %v1033_v54, %v928_v53  ;;  %v930_v57 = vld [vmem:[%s1693_s25 + $0x8] sm:$0xf0]  ;;  %v1175_v62 = vld [vmem:[%s481_s27] ss:$0 sm:$0xff] }
  0x60   : > { %v933_v58 = vor.u32 %v1032_v55, %v930_v57  ;;  %v1176_v2 = vld [vmem:[%s483_s15] ss:$0 sm:$0xff] }
  0x62   : > { %570 = vmatpush.bf16.msra.mxu0 %v961_v27 }
  0x63   : > { %651 = vmatpush.bf16.msra.mxu2 %v1052_v26  ;;  %584 = vmatpush.bf16.msra.mxu1 %v965_v28 }
  0x66   : > { %571 = vmatpush.bf16.msra.mxu0 %v953_v38 }
  0x67   : > { %652 = vmatpush.bf16.msra.mxu2 %v1051_v29  ;;  %585 = vmatpush.bf16.msra.mxu1 %v957_v40 }
  0x6a   : > { %572 = vmatpush.bf16.msra.mxu0 %v945_v44 }
  0x6b   : > { %653 = vmatpush.bf16.msra.mxu2 %v1050_v30  ;;  %586 = vmatpush.bf16.msra.mxu1 %v949_v46 }
  0x6e   : > { %573 = vmatpush.bf16.msra.mxu0 %v937_v50 }
  0x6f   : > { %654 = vmatpush.bf16.msra.mxu2 %v1049_v31  ;;  %587 = vmatpush.bf16.msra.mxu1 %v941_v52 }
  0x72   : > { %655 = vmatmul.bf16.vlgmr.msra.gmra.mxu2 %v595_v34  ;;  %574 = vmatpush.bf16.msra.mxu0 %v929_v56 }
  0x73   : > { %588 = vmatpush.bf16.msra.mxu1 %v933_v58 }
  0x75   : > { %575 = vmatmul.bf16.vlgmr.msra.gmra.mxu0 %v486_v61 }
  0x76   : > { %589 = vmatmul.bf16.vlgmr.msra.gmra.mxu1 %v486_v61 }
  0xf2   : > { %v576_v24 = vpop.f32.mrf.mxu0 }
  0xf3   : > { %v590_v25 = vpop.f32.mrf.mxu1 }
  0xf4   : > { %v715_v30 = vsub.f32 %v590_v25, %v576_v24 }
  0xf5   : > { %v656_v63 = vpop.f32.mrf.mxu2 }
  0xf6   : > { %v657_v0 = vadd.f32 %v1175_v62, %v656_v63 }
  0xf8   : > { %v661_v1 = vmax.f32 %v657_v0, 0.0 }
  0xfa   : > { %v663_v3 = vadd.f32 %v661_v1, %v441_v32  ;;  %v578_v42 = vpop.f32.mrf.mxu0 }
  0xfb   : > { %v592_v43 = vpop.f32.mrf.mxu1 }
  0xfc   : > { %v668_v4 = vmul.f32 %v1176_v2, %v663_v3  ;;  %v716_v47 = vsub.f32 %v592_v43, %v578_v42 }
  0xfd   : > { %v658_v5 = vpop.f32.mrf.mxu2 }
  0xfe   : > { %v659_v6 = vadd.f32 %v1175_v62, %v658_v5  ;;  %670 = vadd.xlane.f32.xlu0 %v668_v4 }
 0x100   : > { %v662_v7 = vmax.f32 %v659_v6, 0.0 }
 0x102   : > { %v664_v8 = vadd.f32 %v662_v7, %v442_v33 }
 0x104   : > { %v669_v9 = vmul.f32 %v1176_v2, %v664_v8 }
 0x106   : > { %672 = vadd.xlane.f32.xlu0 %v669_v9 }
 0x171   : > { %v671_v11 = vpop.xlane.xlu0 %670 }
 0x172   : > { %v675_v12 = vadd.f32 %v674_v10, %v671_v11 }
 0x174   : > { %v1022_v13 = vmul.f32 -1.442695, %v675_v12 }
 0x176   : > { %1177 = vpow2.f32 %v1022_v13 }
 0x179   : > { %v673_v14 = vpop.xlane.xlu0 %672 }
 0x17a   : > { %v676_v15 = vadd.f32 %v674_v10, %v673_v14 }
 0x17c   : > { %v1178_v16 = vpop.eup %1177  ;;  %v1023_v17 = vmul.f32 -1.442695, %v676_v15 }
 0x17d   : > { %v683_v18 = vadd.f32 1.0, %v1178_v16 }
 0x17e   : > { %1179 = vpow2.f32 %v1023_v17 }
 0x17f   : > { %1181 = vrcp.f32 %v683_v18  ;;  %v696_v26 = vand.u32 2147483648, %v683_v18  ;;  %v694_v28 = vand.u32 2147483647, %v683_v18  ;;  %vm690_vm1 = vweird.f32 %v683_v18 }
 0x181   : > { %v697_v32 = vor.u32 1.1754944e-38, %v696_v26  ;;  %vm695_vm3 = vcmp.eq.f32.partialorder %v694_v28, 8.507059e+37 }
 0x184   : > { %v1180_v19 = vpop.eup %1179 }
 0x185   : > { %v1182_v20 = vpop.eup %1181  ;;  %v684_v21 = vadd.f32 1.0, %v1180_v19 }
 0x186   : > { %v686_v22 = vmul.f32 %v1182_v20, %v683_v18  ;;  %vm691_vm0 = vweird.f32 %v1182_v20 }
 0x187   : > { %1183 = vrcp.f32 %v684_v21  ;;  %vm692_vm2 = vmor %vm690_vm1, %vm691_vm0  ;;  %v711_v38 = vand.u32 2147483648, %v684_v21  ;;  %v709_v41 = vand.u32 2147483647, %v684_v21  ;;  %vm705_vm5 = vweird.f32 %v684_v21 }
 0x188   : > { %v687_v23 = vsub.f32 1.0, %v686_v22 }
 0x189   : > { %v712_v45 = vor.u32 1.1754944e-38, %v711_v38  ;;  %vm710_vm7 = vcmp.eq.f32.partialorder %v709_v41, 8.507059e+37 }
 0x18a   : > { %v688_v27 = vmul.f32 %v1182_v20, %v687_v23 }
 0x18c   : > { %v689_v29 = vadd.f32 %v1182_v20, %v688_v27 }
 0x18d   : > { %v1184_v31 = vpop.eup %1183 }
 0x18e   : > { %v693_v33 = vsel %vm692_vm2, %v1182_v20, %v689_v29  ;;  %v701_v34 = vmul.f32 %v1184_v31, %v684_v21  ;;  %vm706_vm4 = vweird.f32 %v1184_v31 }
 0x18f   : > { %v698_v35 = vsel %vm695_vm3, %v697_v32, %v693_v33  ;;  %vm707_vm6 = vmor %vm705_vm5, %vm706_vm4 }
 0x190   : > { %v717_v36 = vmul.f32 %v715_v30, %v698_v35  ;;  %v702_v37 = vsub.f32 1.0, %v701_v34 }
 0x192   : > { %v719_v39 = vadd.f32 %v717_v36, %v576_v24  ;;  %v703_v40 = vmul.f32 %v1184_v31, %v702_v37 }
 0x194   : > { %721 = vst [vmem:[%s434_s11] sm:$0xff] %v719_v39  ;;  %v704_v44 = vadd.f32 %v1184_v31, %v703_v40 }
 0x196   : > { %v708_v46 = vsel %vm707_vm6, %v1184_v31, %v704_v44 }
 0x197   : > { %v713_v48 = vsel %vm710_vm7, %v712_v45, %v708_v46 }
 0x198   : > { %v718_v49 = vmul.f32 %v716_v47, %v713_v48 }
 0x19a   : > { %v720_v50 = vadd.f32 %v718_v49, %v578_v42 }
 0x19c   : > { %722 = vst [vmem:[%s434_s11 + $0x8] sm:$0xff] %v720_v50 }
 0x19d   : > { %1389 = shalt.err (!%p1386_p12)
}
 0x19e   : > { %s1475_s6 = smov 128   ;;  %s1476_s26 = smov 8  }
 0x19f   : > { %1078 = dma.vmem_to_hbm [thread:$0]  (%p1624_p5), %s739_s12, 256, %s741_s0, %s724_s21, %s1475_s6, %s1475_s6, %s1476_s26  }
 0x1a0 PF: > { %p1113_p13 = scmp.ge.s32.totalorder %s1462_s13, 2  ;;  %s755_s27 = sand.u32 1, %s1442_s9  }
 0x1a1   : > { %s756_s15 = scalar_lea.sflag [#allocation6], %s755_s27 }
 0x1a2   : > { %p1101_p0 = pnand %p1113_p13, %p1570_p6 }
 0x1a4   : > { %p1102_p3 = pneg %p1101_p0 }
 0x1a6   : > { %1437 = dma.done.wait (%p1102_p3), %s756_s15, 256  }
 0x1a7   : > { %1439 = vsyncadd (%p1102_p3), %s756_s15, 4294967040  ;;  %s37_s13 = sadd.s32 1, %s1462_s13   ;;  %s1828_s24 = sld [smem:[#allocation23_spill]] }
 0x1a8   : > { %p34_p7 = scmp.ge.s32.totalorder %s37_s13, 6   ;;  %s1829_s11 = sld [smem:[#allocation26_spill]] }
 0x1a9   : > { %s1830_s0 = sld [smem:[#allocation24_spill]]  ;;  %s1832_s9 = smov %s1446_s10 }
 0x1aa   : > { %s1831_s12 = sld [smem:[#allocation25_spill]]  ;;  %36 = sbr.rel (!%p34_p7) target bundleno = 19 (0x13), region = 127 }
 0x1ad   : > { %s1833_s10 = smov %s1828_s24 }
 0x1af   :  { %762 = vsyncpa [#allocation5], 1 }
 0x1b0   :  { %764 = vsyncpa [#allocation5 + $0x1], 1 }
 0x1b1   :  { %765 = vsyncpa [#allocation9], 1 }
 0x1b2   :  { %767 = vsyncpa [#allocation9 + $0x1], 1 }
 0x1b3   :  { %768 = vsyncpa [#allocation12], 1 }
 0x1b4   :  { %769 = vsyncpa [#allocation6], 1 }
 0x1b5   :  { %771 = vsyncpa [#allocation6 + $0x1], 1 }
 0x1b6   :  { %772 = vsyncpa [#allocation7], 1 }
 0x1b7   :  { %774 = vsyncpa [#allocation7 + $0x1], 1 }

</bundles_post_ra>
